<compile_context>
chip_gen: v7x
topology: tpu7x:2x2x1
jax: 0.10.0
libtpu: 0.0.40
codegen_flags: <defaults>
</compile_context>

<pallas_src>
import jax
import jax.numpy as jnp
import numpy as np
from jax.experimental import pallas as pl
from jax.experimental.pallas import tpu as pltpu


def mlp_decoder_kernel(zi_ref, zj_ref,
                       w1_ref, b1_ref,
                       w2_ref, b2_ref,
                       w3_ref, b3_ref,
                       out_ref):
    mm_dt = w1_ref.dtype          # MXU operand dtype (bf16 or f32)

    # elementwise product of the two node embeddings, in f32 (v5e's VPU has no
    # bf16 path); only the MXU operands are cast down.
    h = zi_ref[...].astype(jnp.float32) * zj_ref[...].astype(jnp.float32)

    # lin1 + ReLU  (MXU matmul, f32 accumulate)
    h = jnp.dot(h.astype(mm_dt), w1_ref[...],
                preferred_element_type=jnp.float32) + b1_ref[...]
    h = jnp.maximum(h, 0.0)

    # lin2 + ReLU
    h = jnp.dot(h.astype(mm_dt), w2_ref[...],
                preferred_element_type=jnp.float32) + b2_ref[...]
    h = jnp.maximum(h, 0.0)

    # lin3 (-> 2 features per packed node-pair), no activation
    out = jnp.dot(h.astype(mm_dt), w3_ref[...],
                  preferred_element_type=jnp.float32) + b3_ref[...]
    out_ref[...] = out.astype(out_ref.dtype)


def _sublane_min(dtype):
    return {1: 32, 2: 16, 4: 8}[jnp.dtype(dtype).itemsize]


def mlp_decoder(z_i, z_j, params, *, tile_rows=4096,
                matmul_dtype=jnp.bfloat16,
                dimension_semantics=("parallel",)):
    """params = dict(w1, b1, w2, b2, w3, b3); weights stored as [in, out].

    tile_rows:            node-pair rows per grid step (default 4096; tiny
                          inputs collapse to a single grid step).
    matmul_dtype:         dtype of MXU operands (default bf16, f32 accumulate;
                          pass None for exact f32).
    dimension_semantics:  pass (pltpu.CORE_PARALLEL,) on v7x to shard the row
                          grid across both TensorCores.
    """
    N, H = z_i.shape
    out_dtype = z_i.dtype

    mm_dt = (jnp.dtype(matmul_dtype) if matmul_dtype is not None
             else jnp.dtype(jnp.float32))

    # --- cast activations at the call boundary (halves input DMA for bf16) --
    if matmul_dtype is not None and z_i.dtype != mm_dt:
        z_i = z_i.astype(mm_dt)
        z_j = z_j.astype(mm_dt)

    # --- pack `pack` node-pairs per 128-lane row ----------------------------
    pack = 128 // H if (H < 128 and 128 % H == 0) else 1
    Nr = N
    if N % pack != 0:             # rare: tiny pad so the packing reshape is legal
        padr = pack - N % pack
        z_i = jnp.pad(z_i, ((0, padr), (0, 0)))
        z_j = jnp.pad(z_j, ((0, padr), (0, 0)))
        Nr = N + padr
    Np = Nr // pack
    z_i = z_i.reshape(Np, pack * H)                       # free reshape
    z_j = z_j.reshape(Np, pack * H)

    # block-diagonal weights (pack copies on the diagonal) and tiled biases
    eye = jnp.eye(pack, dtype=mm_dt)
    bd = lambda w: jnp.kron(eye, w.astype(mm_dt))
    w1 = bd(params["w1"])                                 # (pack*H, pack*H)
    w2 = bd(params["w2"])
    w3 = bd(params["w3"])                                 # (pack*H, pack*2)
    b1 = jnp.tile(params["b1"].astype(jnp.float32), pack).reshape(1, pack * H)
    b2 = jnp.tile(params["b2"].astype(jnp.float32), pack).reshape(1, pack * H)
    b3 = jnp.tile(params["b3"].astype(jnp.float32), pack).reshape(1, pack * 2)

    # --- row tile: sublane-aligned for the activation / output dtypes -------
    sub = max(_sublane_min(z_i.dtype), _sublane_min(out_dtype))
    tp = max(1, int(tile_rows)) // pack
    if Np <= tp:
        tp = Np                                           # single grid step
    else:
        tp = max(sub, (tp // sub) * sub)
    grid = (pl.cdiv(Np, tp),)          # ragged tail block handled by Pallas

    act_spec = pl.BlockSpec((tp, pack * H), lambda i: (i, 0))
    full = lambda shape: pl.BlockSpec(shape, lambda i: (0, 0))

    out = pl.pallas_call(
        mlp_decoder_kernel,
        out_shape=jax.ShapeDtypeStruct((Np, pack * 2), out_dtype),
        grid_spec=pltpu.PrefetchScalarGridSpec(
            num_scalar_prefetch=0,
            grid=grid,
            in_specs=[
                act_spec,                       # z_i tile  (tp, pack*H)
                act_spec,                       # z_j tile
                full((pack * H, pack * H)),     # W1 (block-diagonal)
                full((1, pack * H)),            # b1
                full((pack * H, pack * H)),     # W2
                full((1, pack * H)),            # b2
                full((pack * H, pack * 2)),     # W3
                full((1, pack * 2)),            # b3
            ],
            out_specs=pl.BlockSpec((tp, pack * 2), lambda i: (i, 0)),
        ),
        compiler_params=pltpu.CompilerParams(
            dimension_semantics=tuple(dimension_semantics)),
    )(z_i, z_j, w1, b1, w2, b2, w3, b3)

    # unpack: (Np, pack*2) -> (Nr, 2), drop any pad rows
    return out.reshape(Nr, 2)[:N]


def init_params(key, hidden_channels):
    """Deterministic init matching the Linear shapes in __init__.
    PyTorch stores W as [out, in]; we store the transpose [in, out]."""
    H = hidden_channels
    ks = jax.random.split(key, 6)
    bound = 1.0 / np.sqrt(H)
    u = lambda k, shape: jax.random.uniform(k, shape, jnp.float32, -bound, bound)
    return {
        "w1": u(ks[0], (H, H)),
        "b1": u(ks[1], (H,)),
        "w2": u(ks[2], (H, H)),
        "b2": u(ks[3], (H,)),
        "w3": u(ks[4], (H, 2)),
        "b3": u(ks[5], (2,)),
    }


def mlp_decoder_ref(z_i, z_j, p, matmul_dtype=None):
    """Pure-JAX reference mirroring the kernel's operand dtypes."""
    cast = ((lambda x: x.astype(matmul_dtype)) if matmul_dtype is not None
            else (lambda x: x))
    if matmul_dtype is not None:
        z_i = z_i.astype(matmul_dtype)
        z_j = z_j.astype(matmul_dtype)
    h = z_i.astype(jnp.float32) * z_j.astype(jnp.float32)
    h = jnp.dot(cast(h), cast(p["w1"]), preferred_element_type=jnp.float32) + p["b1"]
    h = jax.nn.relu(h)
    h = jnp.dot(cast(h), cast(p["w2"]), preferred_element_type=jnp.float32) + p["b2"]
    h = jax.nn.relu(h)
    return jnp.dot(cast(h), cast(p["w3"]), preferred_element_type=jnp.float32) + p["b3"]


if __name__ == "__main__":
    key = jax.random.PRNGKey(0)
    k_zi, k_zj, k_p, k_zi2, k_zj2 = jax.random.split(key, 5)

    H = 32                      # hidden_channels
    params = init_params(k_p, H)

    # Case 1: the small demo size (N=16), exact f32 path -> single grid step.
    N = 16
    z_i = jax.random.normal(k_zi, (N, H), jnp.float32)
    z_j = jax.random.normal(k_zj, (N, H), jnp.float32)
    out = jax.block_until_ready(mlp_decoder(z_i, z_j, params, matmul_dtype=None))
    ref = mlp_decoder_ref(z_i, z_j, params)
    np.testing.assert_allclose(np.asarray(out), np.asarray(ref),
                               rtol=1e-5, atol=1e-5)
    assert out.shape == (N, 2)

    # Case 2: ragged row count (N=300), default bf16 operands, multi-step
    # cdiv grid with a ragged last block (tile_rows=256 -> 64 packed rows/step).
    N2 = 300
    z_i2 = jax.random.normal(k_zi2, (N2, H), jnp.float32)
    z_j2 = jax.random.normal(k_zj2, (N2, H), jnp.float32)
    out2 = jax.block_until_ready(mlp_decoder(z_i2, z_j2, params, tile_rows=256))
    ref2 = mlp_decoder_ref(z_i2, z_j2, params, matmul_dtype=jnp.bfloat16)
    np.testing.assert_allclose(np.asarray(out2), np.asarray(ref2),
                               rtol=5e-3, atol=5e-3)
    assert out2.shape == (N2, 2)

    print("KERNEL_OK")
</pallas_src>

<mosaic_0001>
module attributes {stable_mosaic.version = 11 : i64} {
  func.func @mlp_decoder_kernel(%arg0: i32, %arg1: memref<4x128xf32, #tpu.memory_space<vmem>>, %arg2: memref<4x128xf32, #tpu.memory_space<vmem>>, %arg3: memref<128x128xf32, #tpu.memory_space<vmem>>, %arg4: memref<1x128xf32, #tpu.memory_space<vmem>>, %arg5: memref<128x128xf32, #tpu.memory_space<vmem>>, %arg6: memref<1x128xf32, #tpu.memory_space<vmem>>, %arg7: memref<128x8xf32, #tpu.memory_space<vmem>>, %arg8: memref<1x8xf32, #tpu.memory_space<vmem>>, %arg9: memref<4x8xf32, #tpu.memory_space<vmem>>) attributes {dimension_semantics = [#tpu.dimension_semantics<parallel>], iteration_bounds = array<i64: 1>, scalar_prefetch = 0 : i64, scratch_operands = 0 : i64, tpu.core_type = #tpu.core_type<tc>, window_params = [{transform_indices = @transform_0, window_bounds = array<i64: 4, 128>}, {transform_indices = @transform_1, window_bounds = array<i64: 4, 128>}, {pipeline_mode = #tpu.pipeline_mode<synchronous>, transform_indices = @transform_2, window_bounds = array<i64: 128, 128>}, {pipeline_mode = #tpu.pipeline_mode<synchronous>, transform_indices = @transform_3, window_bounds = array<i64: 1, 128>}, {pipeline_mode = #tpu.pipeline_mode<synchronous>, transform_indices = @transform_4, window_bounds = array<i64: 128, 128>}, {pipeline_mode = #tpu.pipeline_mode<synchronous>, transform_indices = @transform_5, window_bounds = array<i64: 1, 128>}, {pipeline_mode = #tpu.pipeline_mode<synchronous>, transform_indices = @transform_6, window_bounds = array<i64: 128, 8>}, {pipeline_mode = #tpu.pipeline_mode<synchronous>, transform_indices = @transform_7, window_bounds = array<i64: 1, 8>}, {transform_indices = @transform_8, window_bounds = array<i64: 4, 8>}]} {
    %c0 = arith.constant 0 : index
    %c0_0 = arith.constant 0 : index
    %0 = vector.load %arg1[%c0, %c0_0] : memref<4x128xf32, #tpu.memory_space<vmem>>, vector<4x128xf32>
    %c0_1 = arith.constant 0 : index
    %c0_2 = arith.constant 0 : index
    %1 = vector.load %arg2[%c0_1, %c0_2] : memref<4x128xf32, #tpu.memory_space<vmem>>, vector<4x128xf32>
    %2 = arith.mulf %0, %1 : vector<4x128xf32>
    %c0_3 = arith.constant 0 : index
    %c0_4 = arith.constant 0 : index
    %3 = vector.load %arg3[%c0_3, %c0_4] : memref<128x128xf32, #tpu.memory_space<vmem>>, vector<128x128xf32>
    %cst = arith.constant dense<0.000000e+00> : vector<4x128xf32>
    %4 = tpu.matmul %2, %3, %cst {dimension_numbers = #tpu.dot_dimension_numbers<[1], [0], [0], [1], [0, 0, 1, 1], [], []>} : vector<4x128xf32>, vector<128x128xf32>, vector<4x128xf32> -> vector<4x128xf32>
    %c0_5 = arith.constant 0 : index
    %c0_6 = arith.constant 0 : index
    %5 = vector.load %arg4[%c0_5, %c0_6] : memref<1x128xf32, #tpu.memory_space<vmem>>, vector<1x128xf32>
    %6 = vector.broadcast %5 : vector<1x128xf32> to vector<4x128xf32>
    %7 = arith.addf %4, %6 : vector<4x128xf32>
    %cst_7 = arith.constant 0.000000e+00 : f32
    %8 = vector.broadcast %cst_7 : f32 to vector<4x128xf32>
    %9 = arith.maximumf %7, %8 : vector<4x128xf32>
    %c0_8 = arith.constant 0 : index
    %c0_9 = arith.constant 0 : index
    %10 = vector.load %arg5[%c0_8, %c0_9] : memref<128x128xf32, #tpu.memory_space<vmem>>, vector<128x128xf32>
    %cst_10 = arith.constant dense<0.000000e+00> : vector<4x128xf32>
    %11 = tpu.matmul %9, %10, %cst_10 {dimension_numbers = #tpu.dot_dimension_numbers<[1], [0], [0], [1], [0, 0, 1, 1], [], []>} : vector<4x128xf32>, vector<128x128xf32>, vector<4x128xf32> -> vector<4x128xf32>
    %c0_11 = arith.constant 0 : index
    %c0_12 = arith.constant 0 : index
    %12 = vector.load %arg6[%c0_11, %c0_12] : memref<1x128xf32, #tpu.memory_space<vmem>>, vector<1x128xf32>
    %13 = vector.broadcast %12 : vector<1x128xf32> to vector<4x128xf32>
    %14 = arith.addf %11, %13 : vector<4x128xf32>
    %cst_13 = arith.constant 0.000000e+00 : f32
    %15 = vector.broadcast %cst_13 : f32 to vector<4x128xf32>
    %16 = arith.maximumf %14, %15 : vector<4x128xf32>
    %c0_14 = arith.constant 0 : index
    %c0_15 = arith.constant 0 : index
    %17 = vector.load %arg7[%c0_14, %c0_15] : memref<128x8xf32, #tpu.memory_space<vmem>>, vector<128x8xf32>
    %cst_16 = arith.constant dense<0.000000e+00> : vector<4x8xf32>
    %18 = tpu.matmul %16, %17, %cst_16 {dimension_numbers = #tpu.dot_dimension_numbers<[1], [0], [0], [1], [0, 0, 1, 1], [], []>} : vector<4x128xf32>, vector<128x8xf32>, vector<4x8xf32> -> vector<4x8xf32>
    %c0_17 = arith.constant 0 : index
    %c0_18 = arith.constant 0 : index
    %19 = vector.load %arg8[%c0_17, %c0_18] : memref<1x8xf32, #tpu.memory_space<vmem>>, vector<1x8xf32>
    %20 = vector.broadcast %19 : vector<1x8xf32> to vector<4x8xf32>
    %21 = arith.addf %18, %20 : vector<4x8xf32>
    %c0_19 = arith.constant 0 : index
    %c0_20 = arith.constant 0 : index
    %22 = vector.load %arg9[%c0_19, %c0_20] : memref<4x8xf32, #tpu.memory_space<vmem>>, vector<4x8xf32>
    tpu.vector_store %arg9[%c0_19, %c0_20], %21 {strides = array<i32>} : memref<4x8xf32, #tpu.memory_space<vmem>>, vector<4x8xf32>,
    return
  }
  func.func @transform_0(%arg0: i32) -> (i32, i32) {
    %c0_i32 = arith.constant 0 : i32
    %c0_i32_0 = arith.constant 0 : i32
    return %arg0, %c0_i32 : i32, i32
  }
  func.func @transform_1(%arg0: i32) -> (i32, i32) {
    %c0_i32 = arith.constant 0 : i32
    %c0_i32_0 = arith.constant 0 : i32
    return %arg0, %c0_i32 : i32, i32
  }
  func.func @transform_2(%arg0: i32) -> (i32, i32) {
    %c0_i32 = arith.constant 0 : i32
    %c0_i32_0 = arith.constant 0 : i32
    %c0_i32_1 = arith.constant 0 : i32
    return %c0_i32, %c0_i32_0 : i32, i32
  }
  func.func @transform_3(%arg0: i32) -> (i32, i32) {
    %c0_i32 = arith.constant 0 : i32
    %c0_i32_0 = arith.constant 0 : i32
    %c0_i32_1 = arith.constant 0 : i32
    return %c0_i32, %c0_i32_0 : i32, i32
  }
  func.func @transform_4(%arg0: i32) -> (i32, i32) {
    %c0_i32 = arith.constant 0 : i32
    %c0_i32_0 = arith.constant 0 : i32
    %c0_i32_1 = arith.constant 0 : i32
    return %c0_i32, %c0_i32_0 : i32, i32
  }
  func.func @transform_5(%arg0: i32) -> (i32, i32) {
    %c0_i32 = arith.constant 0 : i32
    %c0_i32_0 = arith.constant 0 : i32
    %c0_i32_1 = arith.constant 0 : i32
    return %c0_i32, %c0_i32_0 : i32, i32
  }
  func.func @transform_6(%arg0: i32) -> (i32, i32) {
    %c0_i32 = arith.constant 0 : i32
    %c0_i32_0 = arith.constant 0 : i32
    %c0_i32_1 = arith.constant 0 : i32
    return %c0_i32, %c0_i32_0 : i32, i32
  }
  func.func @transform_7(%arg0: i32) -> (i32, i32) {
    %c0_i32 = arith.constant 0 : i32
    %c0_i32_0 = arith.constant 0 : i32
    %c0_i32_1 = arith.constant 0 : i32
    return %c0_i32, %c0_i32_0 : i32, i32
  }
  func.func @transform_8(%arg0: i32) -> (i32, i32) {
    %c0_i32 = arith.constant 0 : i32
    %c0_i32_0 = arith.constant 0 : i32
    return %arg0, %c0_i32 : i32, i32
  }
}

</mosaic_0001>

<bundles_post_ra>
// kernel: tpu_custom_call.1
= control target key start
LH: loop header
LB: loop body
LE: loop exit
PB: predicated region body
PF: predicated region fallthrough
CT: control target
= control target key end

     0   :  { %13 = vsyncpa [#allocation3], 0  ;;  %s848_s0 = inlined_call_operand.vmem [shape: f32[4,128], index: 0, kind: input, shape index: {}]   ;;  %s849_s1 = inlined_call_operand.vmem [shape: f32[4,128], index: 1, kind: input, shape index: {}]   ;;  %s850_s2 = inlined_call_operand.vmem [shape: f32[128,128], index: 2, kind: input, shape index: {}]   ;;  %s851_s3 = inlined_call_operand.vmem [shape: f32[1,128], index: 3, kind: input, shape index: {}]   ;;  %s852_s4 = inlined_call_operand.hbm [shape: f32[128,128], index: 4, kind: input, shape index: {}]   ;;  %s853_s5 = inlined_call_operand.vmem [shape: f32[1,128], index: 5, kind: input, shape index: {}]   ;;  %s854_s6 = inlined_call_operand.vmem [shape: f32[128,8], index: 6, kind: input, shape index: {}]   ;;  %s855_s7 = inlined_call_operand.vmem [shape: f32[1,8], index: 7, kind: input, shape index: {}]   ;;  %s856_s8 = inlined_call_operand.hbm [shape: f32[4,8], index: 8, kind: output, shape index: {}]  }
   0x1   :  { %14 = vsyncpa [#allocation4], 0  ;;  %s631_s27 = smov [#allocation2]   ;;  %s583_s9 = scalar_lea.hbm %s852_s4, 2048 }
   0x2   :  { %s28_s28 = sshll.u32 %s631_s27, 4  ;;  %p584_p0 = scmp.ne.s32.totalorder %s852_s4, %s583_s9  ;;  %s29_s28 = int_to_ptr.vmem [resolvable:$true] %s28_s28 }
   0x3   :  { %p587_p1 = scmp.lt.u32.totalorder %s583_s9, %s852_s4 }
   0x5   :  { %p589_p2 = pnand %p587_p1, %p584_p0 }
   0x7   :  { %592 = shalt.err (!%p589_p2)
}
   0x8   :  { %s593_s14 = scalar_lea.vmem %s29_s28, 2048  ;;  %p598_p4 = scmp.lt.s32.totalorder %s29_s28, %s29_s28 }
   0x9   :  { %p594_p3 = scmp.ne.s32.totalorder %s29_s28, %s593_s14  ;;  %p599_p5 = scmp.lt.s32.totalorder %s593_s14, %s593_s14 }
   0xb   :  { %p600_p6 = por %p599_p5, %p598_p4 }
   0xd   :  { %p601_p7 = pnand %p600_p6, %p594_p3 }
   0xf   :  { %604 = shalt.err (!%p601_p7)
}
  0x10   :  { %s632_s15 = smov 128   ;;  %s633_s16 = smov 8  }
  0x11   :  { %34 = dma.hbm_to_vmem [thread:$0]  %s852_s4, 2048, %s29_s28, [#allocation3], %s632_s15, %s632_s15, %s633_s16  }
  0x12   :  { %627 = dma.done.wait [#allocation3], 2048  }
  0x13   :  { %628 = vsyncadd [#allocation3], 4294965248  ;;  %v634_v0 = vmov 0.0|0.0   ;;  %vm635_vm0 = vmmov 0   ;;  %v636_v1 = vmov 0.0   ;;  %v47_v2 = vld [vmem:[%s850_s2] sm:$0xff] }
  0x14   :  { %504 = vmatprep.subr.bf16.mxu0 %v634_v0  ;;  %431 = vmatprep.mubr.msk.f32.mxu0 %vm635_vm0, %v636_v1  ;;  %v48_v3 = vld [vmem:[%s850_s2 + $0x8] sm:$0xff]  ;;  %v49_v4 = vld [vmem:[%s850_s2 + $0x10] sm:$0xff]  ;;  %v50_v6 = vld [vmem:[%s850_s2 + $0x18] sm:$0xff]  ;;  %s637_s17 = smov [#allocation5]   ;;  %vm328_vm1 = vcmask 60416  }
  0x15   :  { %528 = vmatprep.subr.bf16.mxu1 %v634_v0  ;;  %466 = vmatprep.mubr.msk.f32.mxu1 %vm635_vm0, %v636_v1  ;;  %v505_v5 = vpack.c.bf16 %v48_v3, %v47_v2  ;;  %v508_v7 = vpack.c.bf16 %v50_v6, %v49_v4  ;;  %v51_v8 = vld [vmem:[%s850_s2 + $0x20] sm:$0xff]  ;;  %v52_v9 = vld [vmem:[%s850_s2 + $0x28] sm:$0xff]  ;;  %v143_v12 = vld [vmem:[#allocation2 + $0x10] sm:$0xff]  ;;  %s336_s18 = sshll.u32 %s637_s17, 4  ;;  %s337_s18 = int_to_ptr.vmem [resolvable:$true] %s336_s18 }
  0x16   :  { %v141_v10 = vld [vmem:[#allocation2] sm:$0xff]  ;;  %v142_v11 = vld [vmem:[#allocation2 + $0x8] sm:$0xff]  ;;  %v511_v13 = vpack.c.bf16 %v52_v9, %v51_v8  ;;  %v144_v15 = vld [vmem:[#allocation2 + $0x18] sm:$0xff]  ;;  %p610_p9 = scmp.lt.s32.totalorder %s337_s18, %s337_s18 }
  0x17   :  { %506 = vmatpush3.bf16.msra.mxu0 %v505_v5  ;;  %v529_v14 = vpack.c.bf16 %v142_v11, %v141_v10  ;;  %v53_v16 = vld [vmem:[%s850_s2 + $0x30] sm:$0xff]  ;;  %v54_v17 = vld [vmem:[%s850_s2 + $0x38] sm:$0xff]  ;;  %v532_v18 = vpack.c.bf16 %v144_v15, %v143_v12  ;;  %v145_v19 = vld [vmem:[#allocation2 + $0x20] sm:$0xff] }
  0x18   :  { %507 = vmatprep.subr.bf16.mxu0 %v634_v0  ;;  %v146_v20 = vld [vmem:[#allocation2 + $0x28] sm:$0xff]  ;;  %v514_v21 = vpack.c.bf16 %v54_v17, %v53_v16  ;;  %v55_v22 = vld [vmem:[%s850_s2 + $0x40] sm:$0xff]  ;;  %v147_v25 = vld [vmem:[#allocation2 + $0x30] sm:$0xff] }
  0x19   :  { %530 = vmatpush3.bf16.msra.mxu1 %v529_v14  ;;  %v56_v23 = vld [vmem:[%s850_s2 + $0x48] sm:$0xff]  ;;  %v535_v24 = vpack.c.bf16 %v146_v20, %v145_v19  ;;  %v148_v26 = vld [vmem:[#allocation2 + $0x38] sm:$0xff]  ;;  %v57_v28 = vld [vmem:[%s850_s2 + $0x50] sm:$0xff] }
  0x1a   :  { %531 = vmatprep.subr.bf16.mxu1 %v634_v0  ;;  %v517_v27 = vpack.c.bf16 %v56_v23, %v55_v22  ;;  %v58_v29 = vld [vmem:[%s850_s2 + $0x58] sm:$0xff]  ;;  %v538_v30 = vpack.c.bf16 %v148_v26, %v147_v25  ;;  %v149_v31 = vld [vmem:[#allocation2 + $0x40] sm:$0xff]  ;;  %v150_v32 = vld [vmem:[#allocation2 + $0x48] sm:$0xff] }
  0x1b   :  { %509 = vmatpush3.bf16.msra.mxu0 %v508_v7  ;;  %v520_v33 = vpack.c.bf16 %v58_v29, %v57_v28  ;;  %v59_v34 = vld [vmem:[%s850_s2 + $0x60] sm:$0xff]  ;;  %v60_v35 = vld [vmem:[%s850_s2 + $0x68] sm:$0xff]  ;;  %v541_v36 = vpack.c.bf16 %v150_v32, %v149_v31  ;;  %v151_v37 = vld [vmem:[#allocation2 + $0x50] sm:$0xff] }
  0x1c   :  { %510 = vmatprep.subr.bf16.mxu0 %v634_v0  ;;  %v152_v38 = vld [vmem:[#allocation2 + $0x58] sm:$0xff]  ;;  %v523_v39 = vpack.c.bf16 %v60_v35, %v59_v34  ;;  %v61_v40 = vld [vmem:[%s850_s2 + $0x70] sm:$0xff]  ;;  %v153_v43 = vld [vmem:[#allocation2 + $0x60] sm:$0xff] }
  0x1d   :  { %533 = vmatpush3.bf16.msra.mxu1 %v532_v18  ;;  %v62_v41 = vld [vmem:[%s850_s2 + $0x78] sm:$0xff]  ;;  %v544_v42 = vpack.c.bf16 %v152_v38, %v151_v37  ;;  %v154_v44 = vld [vmem:[#allocation2 + $0x68] sm:$0xff]  ;;  %v44_v46 = vld [vmem:[%s848_s0] sm:$0xf] }
  0x1e   :  { %534 = vmatprep.subr.bf16.mxu1 %v634_v0  ;;  %v526_v45 = vpack.c.bf16 %v62_v41, %v61_v40  ;;  %v45_v47 = vld [vmem:[%s849_s1] sm:$0xf]  ;;  %v547_v48 = vpack.c.bf16 %v154_v44, %v153_v43  ;;  %v155_v50 = vld [vmem:[#allocation2 + $0x70] sm:$0xff]  ;;  %v156_v51 = vld [vmem:[#allocation2 + $0x78] sm:$0xff] }
  0x1f   :  { %512 = vmatpush3.bf16.msra.mxu0 %v511_v13  ;;  %v46_v49 = vmul.f32 %v45_v47, %v44_v46  ;;  %v550_v52 = vpack.c.bf16 %v156_v51, %v155_v50  ;;  %v235_v53 = vld [vmem:[%s854_s6] sm:$0xff]  ;;  %v236_v54 = vld [vmem:[%s854_s6 + $0x8] sm:$0xff]  ;;  %v237_v55 = vld [vmem:[%s854_s6 + $0x10] sm:$0xff] }
  0x20   :  { %513 = vmatprep.subr.bf16.mxu0 %v634_v0  ;;  %v553_v56 = vpack.c.bf16 %v236_v54, %v235_v53  ;;  %v238_v57 = vld [vmem:[%s854_s6 + $0x18] sm:$0xff]  ;;  %v239_v59 = vld [vmem:[%s854_s6 + $0x20] sm:$0xff]  ;;  %v240_v60 = vld [vmem:[%s854_s6 + $0x28] sm:$0xff] }
  0x21   :  { %536 = vmatpush3.bf16.msra.mxu1 %v535_v24  ;;  %v556_v58 = vpack.c.bf16 %v238_v57, %v237_v55  ;;  %v559_v61 = vpack.c.bf16 %v240_v60, %v239_v59  ;;  %v241_v62 = vld [vmem:[%s854_s6 + $0x30] sm:$0xff]  ;;  %v242_v63 = vld [vmem:[%s854_s6 + $0x38] sm:$0xff]  ;;  %v243_v2 = vld [vmem:[%s854_s6 + $0x40] sm:$0xff] }
  0x22   :  { %537 = vmatprep.subr.bf16.mxu1 %v634_v0  ;;  %v244_v3 = vld [vmem:[%s854_s6 + $0x48] sm:$0xff]  ;;  %v245_v5 = vld [vmem:[%s854_s6 + $0x50] sm:$0xff]  ;;  %v246_v6 = vld [vmem:[%s854_s6 + $0x58] sm:$0xff] }
  0x23   :  { %515 = vmatpush3.bf16.msra.mxu0 %v514_v21  ;;  %v565_v4 = vpack.c.bf16 %v244_v3, %v243_v2  ;;  %v568_v7 = vpack.c.bf16 %v246_v6, %v245_v5  ;;  %v247_v8 = vld [vmem:[%s854_s6 + $0x60] sm:$0xff]  ;;  %v248_v9 = vld [vmem:[%s854_s6 + $0x68] sm:$0xff]  ;;  %v249_v16 = vld [vmem:[%s854_s6 + $0x70] sm:$0xff] }
  0x24   :  { %516 = vmatprep.subr.bf16.mxu0 %v634_v0  ;;  %v571_v10 = vpack.c.bf16 %v248_v9, %v247_v8  ;;  %v345_v11 = vld [vmem:[%s851_s3] ss:$0 sm:$0xff]  ;;  %v250_v17 = vld [vmem:[%s854_s6 + $0x78] sm:$0xff]  ;;  %s605_s6 = scalar_lea.vmem %s337_s18, 64 }
  0x25   :  { %539 = vmatpush3.bf16.msra.mxu1 %v538_v30  ;;  %v574_v18 = vpack.c.bf16 %v250_v17, %v249_v16  ;;  %v347_v23 = vld [vmem:[%s855_s7] ss:$0 sm:$0xff]  ;;  %p606_p8 = scmp.ne.s32.totalorder %s337_s18, %s605_s6  ;;  %p611_p10 = scmp.lt.s32.totalorder %s605_s6, %s605_s6 }
  0x26   :  { %540 = vmatprep.subr.bf16.mxu1 %v634_v0 }
  0x27   :  { %518 = vmatpush3.bf16.msra.mxu0 %v517_v27  ;;  %p612_p11 = por %p611_p10, %p610_p9 }
  0x28   :  { %519 = vmatprep.subr.bf16.mxu0 %v634_v0 }
  0x29   :  { %542 = vmatpush3.bf16.msra.mxu1 %v541_v36  ;;  %p613_p12 = pnand %p612_p11, %p606_p8 }
  0x2a   :  { %543 = vmatprep.subr.bf16.mxu1 %v634_v0 }
  0x2b   :  { %521 = vmatpush3.bf16.msra.mxu0 %v520_v33 }
  0x2c   :  { %522 = vmatprep.subr.bf16.mxu0 %v634_v0 }
  0x2d   :  { %545 = vmatpush3.bf16.msra.mxu1 %v544_v42 }
  0x2e   :  { %546 = vmatprep.subr.bf16.mxu1 %v634_v0 }
  0x2f   :  { %524 = vmatpush3.bf16.msra.mxu0 %v523_v39 }
  0x30   :  { %525 = vmatprep.subr.bf16.mxu0 %v634_v0 }
  0x31   :  { %548 = vmatpush3.bf16.msra.mxu1 %v547_v48 }
  0x32   :  { %549 = vmatprep.subr.bf16.mxu1 %v634_v0 }
  0x33   :  { %527 = vmatpush3.bf16.msra.mxu0 %v526_v45 }
  0x34   :  { %552 = vmatprep.subr.bf16.mxu0 %v634_v0 }
  0x35   :  { %551 = vmatpush3.bf16.msra.mxu1 %v550_v52 }
  0x36   :  { %432 = vmatmul.mubr.f32.vlgmr.msra.gmra.mrb[0].mxu0 %v46_v49 }
  0x37   :  { %501 = vmatprep.mubr.msk.f32.mxu0 %vm635_vm0, %v636_v1  ;;  %554 = vmatpush3.bf16.msra.mxu0 %v553_v56  ;;  %v562_v1 = vpack.c.bf16 %v242_v63, %v241_v62 }
  0x38   :  { %555 = vmatprep.subr.bf16.mxu0 %v634_v0 }
  0x3b   :  { %557 = vmatpush3.bf16.msra.mxu0 %v556_v58 }
  0x3c   :  { %558 = vmatprep.subr.bf16.mxu0 %v634_v0 }
  0x3f   :  { %560 = vmatpush3.bf16.msra.mxu0 %v559_v61 }
  0x40   :  { %561 = vmatprep.subr.bf16.mxu0 %v634_v0 }
  0x43   :  { %563 = vmatpush3.bf16.msra.mxu0 %v562_v1 }
  0x44   :  { %564 = vmatprep.subr.bf16.mxu0 %v634_v0 }
  0x47   :  { %566 = vmatpush3.bf16.msra.mxu0 %v565_v4 }
  0x48   :  { %567 = vmatprep.subr.bf16.mxu0 %v634_v0 }
  0x4b   :  { %569 = vmatpush3.bf16.msra.mxu0 %v568_v7 }
  0x4c   :  { %570 = vmatprep.subr.bf16.mxu0 %v634_v0 }
  0x4f   :  { %572 = vmatpush3.bf16.msra.mxu0 %v571_v10 }
  0x50   :  { %573 = vmatprep.subr.bf16.mxu0 %v634_v0  ;;  %v346_v0 = vld [vmem:[%s853_s5] ss:$0 sm:$0xff] }
  0x53   :  { %575 = vmatpush3.bf16.msra.mxu0 %v574_v18 }
 0x109   :  { %v136_v12 = vpop.f32.mrb[0].mxu0 }
 0x10a   :  { %v137_v13 = vadd.f32 %v345_v11, %v136_v12  ;;  %v433_v14 = vpop.f32.mrb[1].mxu0 }
 0x10c   :  { %v140_v15 = vmax.f32 %v137_v13, 0.0 }
 0x10e   :  { %467 = vmatmul.mubr.f32.vlgmr.msra.gmra.mrb[0].mxu1 %v140_v15 }
 0x1e1   :  { %v230_v19 = vpop.f32.mrb[0].mxu1 }
 0x1e2   :  { %v231_v20 = vadd.f32 %v346_v0, %v230_v19  ;;  %v468_v21 = vpop.f32.mrb[1].mxu1 }
 0x1e4   :  { %v234_v22 = vmax.f32 %v231_v20, 0.0 }
 0x1e6   :  { %502 = vmatmul.mubr.f32.vlgmr.msra.gmra.mrb[2].mxu0 %v234_v22 }
 0x2b9   :  { %v324_v24 = vpop.f32.mrb[2].mxu0 }
 0x2ba   :  { %v325_v25 = vadd.f32 %v347_v23, %v324_v24  ;;  %v503_v26 = vpop.f32.mrb[3].mxu0 }
 0x2bc   :  { %329 = vst.msk [vmem:[#allocation5] sm:$0xf] %vm328_vm1, %v325_v25 }
 0x2bd   :  { %616 = shalt.err (!%p613_p12)
}
 0x2be   :  { %s617_s20 = scalar_lea.hbm %s856_s8, 64 }
 0x2bf   :  { %p618_p13 = scmp.ne.s32.totalorder %s856_s8, %s617_s20  ;;  %p621_p0 = scmp.lt.u32.totalorder %s617_s20, %s856_s8 }
 0x2c1   :  { %p623_p1 = pnand %p621_p0, %p618_p13 }
 0x2c3   :  { %626 = shalt.err (!%p623_p1)
}
 0x2c4   :  { %339 = dma.vmem_to_hbm [thread:$0]  %s337_s18, 64, %s856_s8, [#allocation4]  }
 0x2c5   :  { %629 = dma.done.wait [#allocation4], 64  }
 0x2c6   :  { %630 = vsyncadd [#allocation4], 4294967232 }
 0x2c7   :  { %343 = vsyncpa [#allocation3], 1 }
 0x2c8   :  { %344 = vsyncpa [#allocation4], 1 }

</bundles_post_ra>
